<compile_context>
chip_gen: v7x
topology: tpu7x:2x2x1
jax: 0.10.0
libtpu: 0.0.40
codegen_flags: <defaults>
</compile_context>

<pallas_src>
import functools

import jax
import jax.numpy as jnp
from jax.experimental import pallas as pl
from jax.experimental.pallas import tpu as pltpu


def _label_smoothing_kernel(pred_ref, target_ref, out_ref, *, num_classes,
                            smoothing, batch, block_b):
    confidence = 1.0 - smoothing
    off_value = smoothing / (num_classes - 1)
    tile_idx = pl.program_id(0)

    pred = pred_ref[...].astype(jnp.float32)            # (TB, C) f32
    tgt = target_ref[...]                                # (TB, 1) int32

    # Numerically stable log-softmax building blocks (no logp materialized).
    row_max = jnp.max(pred, axis=-1, keepdims=True)      # (TB, 1)
    shifted = pred - row_max                              # (TB, C)
    lse = jnp.log(jnp.sum(jnp.exp(shifted), axis=-1, keepdims=True))  # (TB, 1)

    sum_shifted = jnp.sum(shifted, axis=-1, keepdims=True)            # (TB, 1)

    # shifted value at the target class via iota compare + masked row-sum
    # (scatter_ has no direct Pallas equivalent; comparison is exact here).
    class_ids = jax.lax.broadcasted_iota(jnp.int32, shifted.shape, 1)  # (TB, C)
    tgt_shifted = jnp.sum(jnp.where(class_ids == tgt, shifted, 0.0),
                          axis=-1, keepdims=True)                      # (TB, 1)

    # per_row == sum_c( -true_dist_c * logp_c ), expanded algebraically.
    per_row = (-off_value * (sum_shifted - num_classes * lse)
               - (confidence - off_value) * (tgt_shifted - lse))       # (TB, 1)

    # Mask padded rows of a ragged last batch tile (their data is undefined).
    row_ids = (jax.lax.broadcasted_iota(jnp.int32, per_row.shape, 0)
               + tile_idx * block_b)
    per_row = jnp.where(row_ids < batch, per_row, 0.0)

    tile_sum = jnp.sum(per_row)                          # scalar partial sum

    # Lane-dense, (8,128)-aligned partial-sum block: one unmasked vreg store.
    out_ref[...] = jnp.broadcast_to(tile_sum, out_ref.shape).astype(jnp.float32)


def _choose_block_b(batch, num_classes):
    # ~4 MiB (f32-accounted) per pred tile: with double-buffered inputs plus
    # a few (TB, C) f32 temporaries this stays well under the 32 MiB scoped
    # VMEM limit set below on every generation (v5e/v6e: 128 MiB, v7x: 64 MiB
    # physical).
    budget_bytes = 4 * 1024 * 1024
    tb = budget_bytes // max(1, num_classes * 4)
    tb = max(8, min(int(tb), 1024))
    tb = (tb // 8) * 8
    b_padded = ((batch + 7) // 8) * 8
    return max(8, min(tb, b_padded))


def label_smoothing_loss(pred, target, *, num_classes, smoothing=0.1,
                         block_b=None):
    """pred: (B, C) float (f32 or bf16), target: (B,) int -> scalar f32 loss."""
    B, C = pred.shape
    assert C == num_classes
    target2d = target.astype(jnp.int32).reshape(B, 1)

    if block_b is None:
        block_b = _choose_block_b(B, C)
    block_b = max(8, (int(block_b) // 8) * 8)
    num_tiles = (B + block_b - 1) // block_b

    kernel = functools.partial(
        _label_smoothing_kernel, num_classes=C, smoothing=smoothing,
        batch=B, block_b=block_b)

    cost = pl.CostEstimate(
        flops=int(7 * B * C),
        transcendentals=int(B * C),
        bytes_accessed=int(B * C * pred.dtype.itemsize + B * 4
                           + num_tiles * 8 * 128 * 4),
    )

    partials = pl.pallas_call(
        kernel,
        out_shape=jax.ShapeDtypeStruct((num_tiles, 8, 128), jnp.float32),
        grid=(num_tiles,),
        in_specs=[
            pl.BlockSpec((block_b, C), lambda i: (i, 0)),
            pl.BlockSpec((block_b, 1), lambda i: (i, 0)),
        ],
        out_specs=pl.BlockSpec((1, 8, 128), lambda i: (i, 0, 0)),
        compiler_params=pltpu.CompilerParams(
            dimension_semantics=("parallel",),
            vmem_limit_bytes=32 * 1024 * 1024),
        cost_estimate=cost,
    )(pred, target2d)

    # Final reduction over per-tile partial sums in plain JAX (tiny).
    return jnp.sum(partials[:, 0, 0]) / B


if __name__ == "__main__":
    # Small deterministic example consistent with the module's forward:
    # pred: (batch, classes) logits; target: (batch,) class indices.
    num_classes = 16
    batch = 20          # deliberately NOT a multiple of the batch tile
    smoothing = 0.1

    key = jax.random.PRNGKey(0)
    kp, kt = jax.random.split(key)
    pred = jax.random.normal(kp, (batch, num_classes), dtype=jnp.float32)
    target = jax.random.randint(kt, (batch,), 0, num_classes, dtype=jnp.int32)

    # Pure-JAX reference of the same semantics.
    logp = jax.nn.log_softmax(pred, axis=-1)
    true_dist = jnp.full_like(logp, smoothing / (num_classes - 1))
    true_dist = true_dist.at[jnp.arange(batch), target].set(1.0 - smoothing)
    ref = jnp.mean(jnp.sum(-true_dist * logp, axis=-1))

    # 1) Multi-tile path (grid=3, ragged last tile -> exercises row masking).
    loss_tiled = label_smoothing_loss(pred, target, num_classes=num_classes,
                                      smoothing=smoothing, block_b=8)
    jax.block_until_ready(loss_tiled)
    assert jnp.allclose(loss_tiled, ref, rtol=1e-5, atol=1e-5), (loss_tiled, ref)

    # 2) Auto tile-size path (single tile here).
    loss_auto = label_smoothing_loss(pred, target, num_classes=num_classes,
                                     smoothing=smoothing)
    jax.block_until_ready(loss_auto)
    assert jnp.allclose(loss_auto, ref, rtol=1e-5, atol=1e-5), (loss_auto, ref)

    print("KERNEL_OK")
</pallas_src>

<mosaic_0001>
module attributes {stable_mosaic.version = 11 : i64} {
  func.func @_label_smoothing_kernel(%arg0: i32, %arg1: memref<8x16xf32, #tpu.memory_space<vmem>>, %arg2: memref<8x1xi32, #tpu.memory_space<vmem>>, %arg3: memref<1x8x128xf32, #tpu.memory_space<vmem>>) attributes {dimension_semantics = [#tpu.dimension_semantics<parallel>], iteration_bounds = array<i64: 3>, scalar_prefetch = 0 : i64, scratch_operands = 0 : i64, tpu.core_type = #tpu.core_type<tc>, window_params = [{transform_indices = @transform_0, window_bounds = array<i64: 8, 16>}, {transform_indices = @transform_1, window_bounds = array<i64: 8, 1>}, {transform_indices = @transform_2, window_bounds = array<i64: 1, 8, 128>}]} {
    %c0 = arith.constant 0 : index
    %c0_0 = arith.constant 0 : index
    %0 = vector.load %arg1[%c0, %c0_0] : memref<8x16xf32, #tpu.memory_space<vmem>>, vector<8x16xf32>
    %c0_1 = arith.constant 0 : index
    %c0_2 = arith.constant 0 : index
    %1 = vector.load %arg2[%c0_1, %c0_2] : memref<8x1xi32, #tpu.memory_space<vmem>>, vector<8x1xi32>
    %cst = arith.constant dense<0xFF800000> : vector<8xf32>
    %2 = vector.multi_reduction <maximumf>, %0, %cst [1] : vector<8x16xf32> to vector<8xf32>
    %3 = vector.shape_cast %2 : vector<8xf32> to vector<8x1xf32>
    %4 = vector.broadcast %3 : vector<8x1xf32> to vector<8x16xf32>
    %5 = arith.subf %0, %4 : vector<8x16xf32>
    %6 = math.exp %5 : vector<8x16xf32>
    %cst_3 = arith.constant dense<0.000000e+00> : vector<8xf32>
    %7 = vector.multi_reduction <add>, %6, %cst_3 [1] : vector<8x16xf32> to vector<8xf32>
    %8 = vector.shape_cast %7 : vector<8xf32> to vector<8x1xf32>
    %9 = math.log %8 : vector<8x1xf32>
    %cst_4 = arith.constant dense<0.000000e+00> : vector<8xf32>
    %10 = vector.multi_reduction <add>, %5, %cst_4 [1] : vector<8x16xf32> to vector<8xf32>
    %11 = vector.shape_cast %10 : vector<8xf32> to vector<8x1xf32>
    %12 = tpu.iota {dimensions = array<i32: 1>} : vector<8x16xi32>
    %13 = vector.broadcast %1 : vector<8x1xi32> to vector<8x16xi32>
    %14 = arith.cmpi eq, %12, %13 : vector<8x16xi32>
    %cst_5 = arith.constant 0.000000e+00 : f32
    %15 = vector.broadcast %cst_5 : f32 to vector<8x16xf32>
    %16 = arith.select %14, %5, %15 : vector<8x16xi1>, vector<8x16xf32>
    %cst_6 = arith.constant dense<0.000000e+00> : vector<8xf32>
    %17 = vector.multi_reduction <add>, %16, %cst_6 [1] : vector<8x16xf32> to vector<8xf32>
    %18 = vector.shape_cast %17 : vector<8xf32> to vector<8x1xf32>
    %cst_7 = arith.constant 1.600000e+01 : f32
    %19 = vector.broadcast %cst_7 : f32 to vector<8x1xf32>
    %20 = arith.mulf %19, %9 : vector<8x1xf32>
    %21 = arith.subf %11, %20 : vector<8x1xf32>
    %cst_8 = arith.constant -0.00666666683 : f32
    %22 = vector.broadcast %cst_8 : f32 to vector<8x1xf32>
    %23 = arith.mulf %22, %21 : vector<8x1xf32>
    %24 = arith.subf %18, %9 : vector<8x1xf32>
    %cst_9 = arith.constant 0.893333315 : f32
    %25 = vector.broadcast %cst_9 : f32 to vector<8x1xf32>
    %26 = arith.mulf %25, %24 : vector<8x1xf32>
    %27 = arith.subf %23, %26 : vector<8x1xf32>
    %28 = tpu.iota {dimensions = array<i32: 0>} : vector<8x1xi32>
    %c8_i32 = arith.constant 8 : i32
    %29 = arith.muli %arg0, %c8_i32 : i32
    %30 = vector.broadcast %29 : i32 to vector<8x1xi32>
    %31 = arith.addi %28, %30 : vector<8x1xi32>
    %c20_i32 = arith.constant 20 : i32
    %32 = vector.broadcast %c20_i32 : i32 to vector<8x1xi32>
    %33 = arith.cmpi slt, %31, %32 : vector<8x1xi32>
    %cst_10 = arith.constant 0.000000e+00 : f32
    %34 = vector.broadcast %cst_10 : f32 to vector<8x1xf32>
    %35 = arith.select %33, %27, %34 : vector<8x1xi1>, vector<8x1xf32>
    %36 = vector.shape_cast %35 : vector<8x1xf32> to vector<1x8x1xf32>
    %cst_11 = arith.constant dense<0.000000e+00> : vector<1xf32>
    %37 = vector.multi_reduction <add>, %36, %cst_11 [1, 2] : vector<1x8x1xf32> to vector<1xf32>
    %38 = vector.shape_cast %37 : vector<1xf32> to vector<1x1x1xf32>
    %39 = vector.extract %38[0, 0, 0] : f32 from vector<1x1x1xf32>
    %40 = vector.broadcast %39 : f32 to vector<1x8x128xf32>
    %c0_12 = arith.constant 0 : index
    %c0_13 = arith.constant 0 : index
    %c0_14 = arith.constant 0 : index
    %41 = vector.load %arg3[%c0_12, %c0_13, %c0_14] : memref<1x8x128xf32, #tpu.memory_space<vmem>>, vector<1x8x128xf32>
    tpu.vector_store %arg3[%c0_12, %c0_13, %c0_14], %40 {strides = array<i32>} : memref<1x8x128xf32, #tpu.memory_space<vmem>>, vector<1x8x128xf32>,
    return
  }
  func.func @transform_0(%arg0: i32) -> (i32, i32) {
    %c0_i32 = arith.constant 0 : i32
    %c0_i32_0 = arith.constant 0 : i32
    return %arg0, %c0_i32 : i32, i32
  }
  func.func @transform_1(%arg0: i32) -> (i32, i32) {
    %c0_i32 = arith.constant 0 : i32
    %c0_i32_0 = arith.constant 0 : i32
    return %arg0, %c0_i32 : i32, i32
  }
  func.func @transform_2(%arg0: i32) -> (i32, i32, i32) {
    %c0_i32 = arith.constant 0 : i32
    %c0_i32_0 = arith.constant 0 : i32
    %c0_i32_1 = arith.constant 0 : i32
    return %arg0, %c0_i32, %c0_i32_0 : i32, i32, i32
  }
}

</mosaic_0001>

<bundles_post_ra>
// kernel: tpu_custom_call.1
= control target key start
LH: loop header
LB: loop body
LE: loop exit
PB: predicated region body
PF: predicated region fallthrough
CT: control target
= control target key end

     0   :  { %7 = vsyncpa [#allocation3], 0  ;;  %s542_s0 = inlined_call_operand.vmem [shape: f32[20,16], index: 0, kind: input, shape index: {}]   ;;  %s543_s1 = inlined_call_operand.vmem [shape: s32[20,1], index: 1, kind: input, shape index: {}]   ;;  %s544_s2 = inlined_call_operand.hbm [shape: f32[3,8,128], index: 2, kind: output, shape index: {}]  }
   0x1   :  { %9 = vsyncpa [#allocation3 + $0x1], 0  ;;  %s434_s9 = smov 0   ;;  %s436_s10 = smov 0  }
   0x2   :  { %s438_s11 = smov 0   ;;  %s440_s12 = smov 0  }
   0x3 LB: > { %s455_s13 = sadd.s32 4294967295, %s415_s12   ;;  %s294_s14 = sadd.s32 4294967294, %s415_s12   ;;  %s415_s12 = sphi %s440_s12, %s550_s12   ;;  %s411_s11 = sphi %s438_s11, %s549_s11   ;;  %s407_s10 = sphi %s436_s10, %s548_s10   ;;  %s403_s9 = sphi %s434_s9, %s547_s9  }
   0x4   : > { %s459_s15 = sadd.s32 1, %s415_s12   ;;  %s74_s16 = sadd.s32 1, %s411_s11 }
   0x5   : > { %s71_s17 = ssub.s32 %s415_s12, %s459_s15  ;;  %p84_p0 = scmp.ne.s32.totalorder %s411_s11, %s407_s10 }
   0x6   : > { %p72_p1 = scmp.eq.s32.totalorder %s71_s17, 0  ;;  %p85_p2 = scmp.eq.s32.totalorder %s455_s13, 2 }
   0x7   : > { %p90_p3 = scmp.ne.s32.totalorder %s407_s10, %s403_s9  ;;  %p91_p4 = scmp.eq.s32.totalorder %s294_s14, 2 }
   0x8   : > { %s470_s18 = scalar_select %p72_p1, %s411_s11, %s74_s16  }
   0x9   : > { %p472_p5 = por %p85_p2, %p84_p0  ;;  %p476_p6 = por %p91_p4, %p90_p3 }
   0xa   : > { %p297_p7 = scmp.ge.s32.totalorder %s415_s12, 1  ;;  %p123_p8 = scmp.lt.s32.totalorder %s415_s12, 4 }
   0xc   : > { %p124_p9 = pnand %p297_p7, %p123_p8 }
   0xd   : > { %p148_p10 = scmp.lt.s32.totalorder (!%p124_p9), %s455_s13, 2  ;;  %v417_v0 = vmov (!%p124_p9), 0   ;;  %vm158_vm0 = vcmask (!%p124_p9), 130048   ;;  %v173_v7 = vlaneseq (!%p124_p9)  ;;  %s301_s29 = sshll.u32 (!%p124_p9), %s455_s13, 3  ;;  %vm196_vm3 = vcmask (!%p124_p9), 7168  }
   0xe   : > { %127 = sbr.rel (%p124_p9) target bundleno = 569 (0x239), region = 28  ;;  %348 = vset.pattern.permute.xlu0 (!%p124_p9), %v417_v0  ;;  %v192_v20 = vstv (!%p124_p9), %s301_s29  ;;  %s145_s30 = sand.u32 (!%p124_p9), 1, %s407_s10  }
   0xf   : > { %v174_v8 = vand.u32 (!%p124_p9), 127, %v173_v7  ;;  %v190_v18 = vshrl.u32 (!%p124_p9), %v173_v7, 7  ;;  %s298_s3 = sshll.u32 (!%p124_p9), %s145_s30, 3  ;;  %s303_s6 = sshll.u32 (!%p124_p9), %s455_s13, 7 }
  0x10   : > { %s147_s4 = scalar_lea.vmem (!%p124_p9), [#allocation2], %s298_s3  ;;  %s502_s16 = scalar_lea.hbm (!%p124_p9), %s544_s2, %s303_s6 }
  0x11   : > { %v193_v24 = vadd.s32 (!%p124_p9), %v192_v20, %v190_v18  ;;  %s223_s5 = sshll.u32 (!%p124_p9), %s147_s4, 4  ;;  %s210_s17 = scalar_lea.sflag (!%p124_p9), [#allocation3], %s145_s30  ;;  %s497_s5 = int_to_ptr.vmem [resolvable:$true] %s223_s5 }
  0x13   : > { %vm194_vm2 = vcmp.lt.s32.totalorder (!%p124_p9), %v193_v24, 20 }
  0x15   : > { %s149_s21 = scalar_select %p148_p10, %s455_s13, 2 }
  0x16   : > { %s418_s13 = smov [#allocation2]  }
  0x17   : > { %s299_s22 = sshll.u32 %s149_s21, 3  ;;  %s353_s21 = scalar_lea.vmem %s497_s5, 128 }
  0x18   : > { %s151_s25 = scalar_lea.vmem %s542_s0, %s299_s22  ;;  %s155_s28 = scalar_lea.vmem %s543_s1, %s299_s22 }
  0x19   : > { %v156_v1 = vld [vmem:[%s151_s25] sm:$0xff]  ;;  %p354_p11 = scmp.ne.s32.totalorder %s497_s5, %s353_s21  ;;  %s357_s22 = sshll.u32 %s418_s13, 4  ;;  %s358_s22 = int_to_ptr.vmem [resolvable:$false] %s357_s22 }
  0x1a   : > { %v159_v2 = vsel %vm158_vm0, %v156_v1, -inf  ;;  %v157_v3 = vld [vmem:[%s155_s28] sm:$0xff]  ;;  %s359_s23 = scalar_lea.vmem %s358_s22, 256  ;;  %p360_p0 = scmp.lt.s32.totalorder %s497_s5, %s358_s22 }
  0x1b   : > { %160 = vmax.xlane.f32.xlu0 %v159_v2  ;;  %p355_p12 = pnand %p354_p11, %p472_p5  ;;  %p361_p1 = scmp.lt.s32.totalorder %s359_s23, %s353_s21 }
  0x1d   : > { %p356_p13 = pneg %p355_p12  ;;  %p362_p2 = por %p361_p1, %p360_p0 }
  0x1f   : > { %p363_p3 = pnand %p362_p2, %p356_p13 }
  0x31   : > { %176 = vperm.xlu0 %348, %v157_v3  }
  0xa8   : > { %v161_v4 = vpop.xlane.xlu0 %160 }
  0xa9   : > { %v162_v5 = vsub.f32 %v156_v1, %v161_v4 }
  0xab   : > { %v163_v6 = vmul.f32 1.442695, %v162_v5  ;;  %v170_v12 = vsel %vm158_vm0, %v162_v5, 0.0 }
  0xad   : > { %349 = vpow2.f32 %v163_v6 }
  0xb0   : > { %v177_v10 = vpop.permute.xlu0 %176 }
  0xb1   : > { %vm178_vm1 = vcmp.eq.s32.totalorder %v174_v8, %v177_v10 }
  0xb2   : > { %v179_v13 = vsel %vm178_vm1, %v162_v5, 0.0 }
  0xb3   : > { %v180_v14 = vsel %vm158_vm0, %v179_v13, 0.0 }
  0xb7   : > { %v350_v9 = vpop.eup %349 }
  0xb8   : > { %v165_v11 = vsel %vm158_vm0, %v350_v9, 0.0 }
  0xb9   : > { %166 = vadd.xlane.f32.xlu1 %v165_v11 }
  0xbd   : > { %171 = vadd.xlane.f32.xlu1 %v170_v12 }
  0xc1   : > { %181 = vadd.xlane.f32.xlu1 %v180_v14 }
 0x146   : > { %v167_v15 = vpop.xlane.xlu1 %166 }
 0x147   : > { %351 = vlog2.f32 %v167_v15 }
 0x14a   : > { %v172_v16 = vpop.xlane.xlu1 %171 }
 0x14e   : > { %v182_v21 = vpop.xlane.xlu1 %181 }
 0x151   : > { %v352_v17 = vpop.eup %351 }
 0x152   : > { %v169_v19 = vmul.f32 0.6931472, %v352_v17 }
 0x154   : > { %v183_v22 = vmul.f32 16.0, %v169_v19  ;;  %v186_v23 = vsub.f32 %v182_v21, %v169_v19 }
 0x156   : > { %v184_v25 = vsub.f32 %v172_v16, %v183_v22  ;;  %v187_v27 = vmul.f32 0.8933333, %v186_v23 }
 0x158   : > { %v185_v26 = vmul.f32 -0.006666667, %v184_v25 }
 0x15a   : > { %v188_v28 = vsub.f32 %v185_v26, %v187_v27 }
 0x15c   : > { %v195_v29 = vsel %vm194_vm2, %v188_v28, 0.0 }
 0x15d   : > { %v197_v30 = vsel %vm196_vm3, %v195_v29, 0.0 }
 0x15e   : > { %198 = vadd.xlane.f32.xlu1 %v197_v30 }
 0x1eb   : > { %v199_v31 = vpop.xlane.xlu1 %198 }
 0x1ec   : > { %v200_v32 = vrot.slane %v199_v31, 4 }
 0x1ee   : > { %v201_v33 = vadd.f32 %v200_v32, %v199_v31 }
 0x1f0   : > { %v202_v34 = vrot.slane %v201_v33, 2 }
 0x1f2   : > { %v203_v35 = vadd.f32 %v202_v34, %v201_v33 }
 0x1f4   : > { %v204_v36 = vrot.slane %v203_v35, 1 }
 0x1f6   : > { %v205_v37 = vadd.f32 %v204_v36, %v203_v35 }
 0x1f8   : > { %306 = vpush %v205_v37 }
 0x229   : > { %s307_s7 = spop %306 }
 0x22a   : > { %v207_v38 = vstv %s307_s7 }
 0x22b   : > { %208 = vst [vmem:[%s147_s4] sm:$0xff] %v207_v38 }
 0x22c   : > { %366 = shalt.err (!%p363_p3)
}
 0x22d   : > { %s367_s24 = scalar_lea.hbm %s502_s16, 128  ;;  %s371_s27 = scalar_lea.hbm %s544_s2, 384 }
 0x22e   : > { %p368_p4 = scmp.ne.s32.totalorder %s502_s16, %s367_s24  ;;  %p372_p9 = scmp.lt.u32.totalorder %s502_s16, %s544_s2 }
 0x22f   : > { %p373_p10 = scmp.lt.u32.totalorder %s371_s27, %s367_s24  ;;  %p375_p12 = scmp.lt.u32.totalorder %s367_s24, %s502_s16 }
 0x230   : > { %p369_p7 = pnand %p368_p4, %p472_p5 }
 0x231   : > { %p374_p11 = por %p373_p10, %p372_p9 }
 0x232   : > { %p370_p8 = pneg %p369_p7 }
 0x233   : > { %p376_p13 = por %p375_p12, %p374_p11 }
 0x235   : > { %p377_p0 = pnand %p376_p13, %p370_p8 }
 0x237   : > { %380 = shalt.err (!%p377_p0)
}
 0x238   : > { %308 = dma.vmem_to_hbm [thread:$0]  (%p472_p5), %s497_s5, 128, %s502_s16, %s210_s17  }
 0x239 PF: > { %p314_p1 = scmp.ge.s32.totalorder %s415_s12, 2  ;;  %s235_s30 = sand.u32 1, %s403_s9  }
 0x23a   : > { %s236_s3 = scalar_lea.sflag [#allocation3], %s235_s30 }
 0x23b   : > { %p311_p2 = pnand %p314_p1, %p476_p6 }
 0x23d   : > { %398 = dma.done.wait (!%p311_p2), %s236_s3, 128  }
 0x23e   : > { %400 = vsyncadd (!%p311_p2), %s236_s3, 4294967168  ;;  %p12_p3 = scmp.ge.s32.totalorder %s459_s15, 5   ;;  %s547_s9 = smov %s407_s10 }
 0x23f   : > { %s548_s10 = smov %s411_s11  ;;  %s549_s11 = smov %s470_s18 }
 0x240   : > { %s550_s12 = smov %s459_s15  ;;  %14 = sbr.rel (!%p12_p3) target bundleno = 3 (0x3), region = 66 }
 0x247   :  { %241 = vsyncpa [#allocation3], 1 }
 0x248   :  { %243 = vsyncpa [#allocation3 + $0x1], 1 }

</bundles_post_ra>
